<compile_context>
chip_gen: v7x
topology: tpu7x:2x2x1
jax: 0.10.0
libtpu: 0.0.40
codegen_flags: <defaults>
</compile_context>

<pallas_src>
import jax
import jax.numpy as jnp
import numpy as np
from jax.experimental import pallas as pl
from jax.experimental.pallas import tpu as pltpu


def _round_up(x: int, m: int) -> int:
    return ((x + m - 1) // m) * m


def _make_kernel(shifts, c_in_pad: int, slab: int):
    n_taps = len(shifts)

    def kernel(x_ref, w_ref, b_ref, o_ref, patch_ref):
        # x_ref:     (1, c_in_pad, in_len)        flat, zero-padded (UNdilated) input frame
        # w_ref:     (s*s*C_out, n_taps*c_in_pad) packed sub-pixel weight (lane-dense)
        # b_ref:     (s*s*C_out, 1)
        # o_ref:     (1, s*s*C_out, slab)         128-lane-aligned output slab
        # patch_ref: (n_taps*c_in_pad, slab)      VMEM scratch: im2col patch matrix
        xf = x_ref[0]                                           # (c_in_pad, in_len)
        # Build the im2col patch matrix: each tap is a lane-contiguous static slice of
        # the flat input, written to a sublane-aligned row block of the scratch.
        for t in range(n_taps):
            patch_ref[t * c_in_pad:(t + 1) * c_in_pad, :] = (
                xf[:, shifts[t]:shifts[t] + slab].astype(jnp.float32))
        # Single fused MXU matmul over K = n_taps * c_in_pad (instead of 25 K=4 dots).
        acc = jnp.dot(w_ref[...], patch_ref[...], preferred_element_type=jnp.float32)
        acc = acc + b_ref[...]                                  # (s*s*C_out, 1) broadcast
        o_ref[0] = jnp.maximum(acc, 0.0).astype(o_ref.dtype)    # ReLU

    return kernel


def deconv_upsample_block(x: jax.Array, w_t: jax.Array, b: jax.Array,
                          *, stride: int = 2, padding: int | None = None) -> jax.Array:
    """relu(ConvTranspose2d(x))   x: (N,Cin,H,W)   w_t: (Cin,Cout,k,k) [PyTorch layout]."""
    N, C_in, H, W = x.shape
    C_in_w, C_out, k, k2 = w_t.shape
    assert k == k2 and C_in_w == C_in
    s = stride
    p = k // 2 if padding is None else padding

    # Output geometry (output_padding = 0, dilation = 1).
    Hout = (H - 1) * s - 2 * p + k
    Wout = (W - 1) * s - 2 * p + k
    Msup = -(-Hout // s)          # super-pixel rows  (output rows = s*m + r)
    Nsup = -(-Wout // s)          # super-pixel cols  (output cols = s*n + c)

    # Sub-pixel tap window: output row s*m + r reads input row m + dh where
    # kh = r + p - s*dh must lie in [0, k).  (Square kernel -> same range for cols.)
    lo = min(-((k - 1 - r - p) // s) for r in range(s))
    hi = max((r + p) // s for r in range(s))
    assert lo <= 0 <= hi
    R = hi - lo + 1               # patch window size (3 for k=5, s=2)
    pad_lead = -lo

    pad_tail_h = max(0, Msup + hi - H)
    pad_tail_w = max(0, Nsup + hi - W)
    Hp = pad_lead + H + pad_tail_h
    Wp = pad_lead + W + pad_tail_w

    C_in_pad = _round_up(C_in, 8)                               # sublane-aligned channel blocks
    slab = _round_up(Msup * Wp, 128)                            # 128-lane aligned output slab
    max_shift = (R - 1) * (Wp + 1)
    in_len = _round_up(max(Hp * Wp, slab + max_shift), 128)

    # ---- wrapper-side layout prep (pure data plumbing) ------------------------------
    xp = jnp.pad(x, ((0, 0), (0, C_in_pad - C_in),
                     (pad_lead, pad_tail_h), (pad_lead, pad_tail_w)))
    x_flat = jnp.pad(xp.reshape(N, C_in_pad, Hp * Wp),
                     ((0, 0), (0, 0), (0, in_len - Hp * Wp)))

    # Packed sub-pixel weight: rows = (r, c, co), cols = (dh1, dw1, ci).
    rr = np.arange(s).reshape(s, 1, 1, 1)
    cc = np.arange(s).reshape(1, s, 1, 1)
    d1 = np.arange(R).reshape(1, 1, R, 1)
    d2 = np.arange(R).reshape(1, 1, 1, R)
    kh = rr + p - s * (d1 + lo)
    kw = cc + p - s * (d2 + lo)
    valid = (kh >= 0) & (kh < k) & (kw >= 0) & (kw < k)         # (s, s, R, R)
    khc = np.clip(kh, 0, k - 1)
    kwc = np.clip(kw, 0, k - 1)
    w_g = w_t[:, :, khc, kwc]                                   # (Cin, Cout, s, s, R, R)
    w_g = jnp.where(jnp.asarray(valid)[None, None], w_g, 0.0)
    w_sub = jnp.transpose(w_g, (2, 3, 1, 4, 5, 0))              # (s, s, Cout, R, R, Cin)
    w_sub = jnp.pad(w_sub, ((0, 0),) * 5 + ((0, C_in_pad - C_in),))
    w_packed = w_sub.reshape(s * s * C_out, R * R * C_in_pad).astype(jnp.float32)
    b_packed = jnp.tile(b.astype(jnp.float32), s * s).reshape(s * s * C_out, 1)

    shifts = tuple(dh1 * Wp + dw1 for dh1 in range(R) for dw1 in range(R))
    kernel = _make_kernel(shifts, C_in_pad, slab)

    out_slab = pl.pallas_call(
        kernel,
        out_shape=jax.ShapeDtypeStruct((N, s * s * C_out, slab), x.dtype),
        grid=(N,),
        in_specs=[
            pl.BlockSpec((1, C_in_pad, in_len), lambda n: (n, 0, 0)),
            pl.BlockSpec((s * s * C_out, R * R * C_in_pad), lambda n: (0, 0)),
            pl.BlockSpec((s * s * C_out, 1), lambda n: (0, 0)),
        ],
        out_specs=pl.BlockSpec((1, s * s * C_out, slab), lambda n: (n, 0, 0)),
        scratch_shapes=[pltpu.VMEM((R * R * C_in_pad, slab), jnp.float32)],
        compiler_params=pltpu.CompilerParams(
            dimension_semantics=("parallel",),
        ),
    )(x_flat, w_packed, b_packed)

    # TODO(synk): the pixel-shuffle interleave of the s*s phases and the (Hout, Wout)
    # crop are pure layout and stay in the XLA wrapper per perf guidance.
    core = out_slab[:, :, :Msup * Wp].reshape(N, s, s, C_out, Msup, Wp)[..., :Nsup]
    out = jnp.transpose(core, (0, 3, 4, 1, 5, 2)).reshape(N, C_out, s * Msup, s * Nsup)
    return out[:, :, :Hout, :Wout]


def _reference(x, w_t, b, stride, padding):
    """Pure-JAX transliteration of relu(nn.ConvTranspose2d(stride, padding)(x))."""
    k = w_t.shape[-1]
    w_conv = jnp.transpose(w_t, (1, 0, 2, 3))[:, :, ::-1, ::-1]
    pad = k - 1 - padding
    y = jax.lax.conv_general_dilated(
        x.astype(jnp.float32),
        w_conv.astype(jnp.float32),
        window_strides=(1, 1),
        padding=[(pad, pad), (pad, pad)],
        lhs_dilation=(stride, stride),
        rhs_dilation=(1, 1),
        dimension_numbers=("NCHW", "OIHW", "NCHW"),
    )
    y = y + b.astype(jnp.float32)[None, :, None, None]
    return jnp.maximum(y, 0.0).astype(x.dtype)


if __name__ == "__main__":
    key = jax.random.PRNGKey(0)
    kx, kw, kb = jax.random.split(key, 3)

    # Small shapes consistent with the module: in_channels=4, mid_channels=8, kernel_1=5.
    N, C_in, H, W = 2, 4, 16, 16
    C_mid, k = 8, 5

    x = jax.random.normal(kx, (N, C_in, H, W), dtype=jnp.float32)
    w_t = 0.1 * jax.random.normal(kw, (C_in, C_mid, k, k), dtype=jnp.float32)  # PyTorch IOHW
    b = 0.1 * jax.random.normal(kb, (C_mid,), dtype=jnp.float32)

    out = deconv_upsample_block(x, w_t, b, stride=2, padding=k // 2)
    out = jax.block_until_ready(out)

    ref = _reference(x, w_t, b, stride=2, padding=k // 2)
    assert out.shape == ref.shape == (N, C_mid, 2 * H - 1, 2 * W - 1), (out.shape, ref.shape)
    max_err = float(jnp.max(jnp.abs(out - ref)))
    assert max_err < 1e-3, f"mismatch vs reference, max abs err = {max_err}"

    print("KERNEL_OK")
</pallas_src>

<mosaic_0001>
module attributes {stable_mosaic.version = 11 : i64} {
  func.func @kernel(%arg0: i32, %arg1: memref<1x8x512xf32, #tpu.memory_space<vmem>>, %arg2: memref<32x72xf32, #tpu.memory_space<vmem>>, %arg3: memref<32x1xf32, #tpu.memory_space<vmem>>, %arg4: memref<1x32x384xf32, #tpu.memory_space<vmem>>, %arg5: memref<72x384xf32, #tpu.memory_space<vmem>>) attributes {dimension_semantics = [#tpu.dimension_semantics<parallel>], iteration_bounds = array<i64: 2>, scalar_prefetch = 0 : i64, scratch_operands = 1 : i64, tpu.core_type = #tpu.core_type<tc>, window_params = [{transform_indices = @transform_0, window_bounds = array<i64: 1, 8, 512>}, {pipeline_mode = #tpu.pipeline_mode<synchronous>, transform_indices = @transform_1, window_bounds = array<i64: 32, 72>}, {pipeline_mode = #tpu.pipeline_mode<synchronous>, transform_indices = @transform_2, window_bounds = array<i64: 32, 1>}, {transform_indices = @transform_3, window_bounds = array<i64: 1, 32, 384>}]} {
    %c0 = arith.constant 0 : index
    %c0_0 = arith.constant 0 : index
    %c0_1 = arith.constant 0 : index
    %0 = vector.load %arg1[%c0, %c0_0, %c0_1] : memref<1x8x512xf32, #tpu.memory_space<vmem>>, vector<1x8x512xf32>
    %1 = vector.shape_cast %0 : vector<1x8x512xf32> to vector<8x512xf32>
    %2 = vector.extract_strided_slice %1 {offsets = [0, 0], sizes = [8, 384], strides = [1, 1]} : vector<8x512xf32> to vector<8x384xf32>
    %c0_2 = arith.constant 0 : index
    %c0_3 = arith.constant 0 : index
    %3 = vector.load %arg5[%c0_2, %c0_3] : memref<72x384xf32, #tpu.memory_space<vmem>>, vector<8x384xf32>
    tpu.vector_store %arg5[%c0_2, %c0_3], %2 {strides = array<i32>} : memref<72x384xf32, #tpu.memory_space<vmem>>, vector<8x384xf32>,
    %4 = vector.extract_strided_slice %1 {offsets = [0, 1], sizes = [8, 384], strides = [1, 1]} : vector<8x512xf32> to vector<8x384xf32>
    %c8 = arith.constant 8 : index
    %c0_4 = arith.constant 0 : index
    %5 = vector.load %arg5[%c8, %c0_4] : memref<72x384xf32, #tpu.memory_space<vmem>>, vector<8x384xf32>
    tpu.vector_store %arg5[%c8, %c0_4], %4 {strides = array<i32>} : memref<72x384xf32, #tpu.memory_space<vmem>>, vector<8x384xf32>,
    %6 = vector.extract_strided_slice %1 {offsets = [0, 2], sizes = [8, 384], strides = [1, 1]} : vector<8x512xf32> to vector<8x384xf32>
    %c16 = arith.constant 16 : index
    %c0_5 = arith.constant 0 : index
    %7 = vector.load %arg5[%c16, %c0_5] : memref<72x384xf32, #tpu.memory_space<vmem>>, vector<8x384xf32>
    tpu.vector_store %arg5[%c16, %c0_5], %6 {strides = array<i32>} : memref<72x384xf32, #tpu.memory_space<vmem>>, vector<8x384xf32>,
    %8 = vector.extract_strided_slice %1 {offsets = [0, 18], sizes = [8, 384], strides = [1, 1]} : vector<8x512xf32> to vector<8x384xf32>
    %c24 = arith.constant 24 : index
    %c0_6 = arith.constant 0 : index
    %9 = vector.load %arg5[%c24, %c0_6] : memref<72x384xf32, #tpu.memory_space<vmem>>, vector<8x384xf32>
    tpu.vector_store %arg5[%c24, %c0_6], %8 {strides = array<i32>} : memref<72x384xf32, #tpu.memory_space<vmem>>, vector<8x384xf32>,
    %10 = vector.extract_strided_slice %1 {offsets = [0, 19], sizes = [8, 384], strides = [1, 1]} : vector<8x512xf32> to vector<8x384xf32>
    %c32 = arith.constant 32 : index
    %c0_7 = arith.constant 0 : index
    %11 = vector.load %arg5[%c32, %c0_7] : memref<72x384xf32, #tpu.memory_space<vmem>>, vector<8x384xf32>
    tpu.vector_store %arg5[%c32, %c0_7], %10 {strides = array<i32>} : memref<72x384xf32, #tpu.memory_space<vmem>>, vector<8x384xf32>,
    %12 = vector.extract_strided_slice %1 {offsets = [0, 20], sizes = [8, 384], strides = [1, 1]} : vector<8x512xf32> to vector<8x384xf32>
    %c40 = arith.constant 40 : index
    %c0_8 = arith.constant 0 : index
    %13 = vector.load %arg5[%c40, %c0_8] : memref<72x384xf32, #tpu.memory_space<vmem>>, vector<8x384xf32>
    tpu.vector_store %arg5[%c40, %c0_8], %12 {strides = array<i32>} : memref<72x384xf32, #tpu.memory_space<vmem>>, vector<8x384xf32>,
    %14 = vector.extract_strided_slice %1 {offsets = [0, 36], sizes = [8, 384], strides = [1, 1]} : vector<8x512xf32> to vector<8x384xf32>
    %c48 = arith.constant 48 : index
    %c0_9 = arith.constant 0 : index
    %15 = vector.load %arg5[%c48, %c0_9] : memref<72x384xf32, #tpu.memory_space<vmem>>, vector<8x384xf32>
    tpu.vector_store %arg5[%c48, %c0_9], %14 {strides = array<i32>} : memref<72x384xf32, #tpu.memory_space<vmem>>, vector<8x384xf32>,
    %16 = vector.extract_strided_slice %1 {offsets = [0, 37], sizes = [8, 384], strides = [1, 1]} : vector<8x512xf32> to vector<8x384xf32>
    %c56 = arith.constant 56 : index
    %c0_10 = arith.constant 0 : index
    %17 = vector.load %arg5[%c56, %c0_10] : memref<72x384xf32, #tpu.memory_space<vmem>>, vector<8x384xf32>
    tpu.vector_store %arg5[%c56, %c0_10], %16 {strides = array<i32>} : memref<72x384xf32, #tpu.memory_space<vmem>>, vector<8x384xf32>,
    %18 = vector.extract_strided_slice %1 {offsets = [0, 38], sizes = [8, 384], strides = [1, 1]} : vector<8x512xf32> to vector<8x384xf32>
    %c64 = arith.constant 64 : index
    %c0_11 = arith.constant 0 : index
    %19 = vector.load %arg5[%c64, %c0_11] : memref<72x384xf32, #tpu.memory_space<vmem>>, vector<8x384xf32>
    tpu.vector_store %arg5[%c64, %c0_11], %18 {strides = array<i32>} : memref<72x384xf32, #tpu.memory_space<vmem>>, vector<8x384xf32>,
    %c0_12 = arith.constant 0 : index
    %c0_13 = arith.constant 0 : index
    %20 = vector.load %arg2[%c0_12, %c0_13] : memref<32x72xf32, #tpu.memory_space<vmem>>, vector<32x72xf32>
    %c0_14 = arith.constant 0 : index
    %c0_15 = arith.constant 0 : index
    %21 = vector.load %arg5[%c0_14, %c0_15] : memref<72x384xf32, #tpu.memory_space<vmem>>, vector<72x384xf32>
    %cst = arith.constant dense<0.000000e+00> : vector<32x384xf32>
    %22 = tpu.matmul %20, %21, %cst {dimension_numbers = #tpu.dot_dimension_numbers<[1], [0], [0], [1], [0, 0, 1, 1], [], []>} : vector<32x72xf32>, vector<72x384xf32>, vector<32x384xf32> -> vector<32x384xf32>
    %c0_16 = arith.constant 0 : index
    %c0_17 = arith.constant 0 : index
    %23 = vector.load %arg3[%c0_16, %c0_17] : memref<32x1xf32, #tpu.memory_space<vmem>>, vector<32x1xf32>
    %24 = vector.broadcast %23 : vector<32x1xf32> to vector<32x384xf32>
    %25 = arith.addf %22, %24 : vector<32x384xf32>
    %cst_18 = arith.constant 0.000000e+00 : f32
    %26 = vector.broadcast %cst_18 : f32 to vector<32x384xf32>
    %27 = arith.maximumf %25, %26 : vector<32x384xf32>
    %c0_19 = arith.constant 0 : index
    %c0_20 = arith.constant 0 : index
    %c0_21 = arith.constant 0 : index
    %28 = vector.load %arg4[%c0_19, %c0_20, %c0_21] : memref<1x32x384xf32, #tpu.memory_space<vmem>>, vector<1x32x384xf32>
    %29 = vector.shape_cast %28 : vector<1x32x384xf32> to vector<32x384xf32>
    %30 = vector.shape_cast %27 : vector<32x384xf32> to vector<1x32x384xf32>
    tpu.vector_store %arg4[%c0_19, %c0_20, %c0_21], %30 {strides = array<i32>} : memref<1x32x384xf32, #tpu.memory_space<vmem>>, vector<1x32x384xf32>,
    return
  }
  func.func @transform_0(%arg0: i32) -> (i32, i32, i32) {
    %c0_i32 = arith.constant 0 : i32
    %c0_i32_0 = arith.constant 0 : i32
    %c0_i32_1 = arith.constant 0 : i32
    return %arg0, %c0_i32, %c0_i32_0 : i32, i32, i32
  }
  func.func @transform_1(%arg0: i32) -> (i32, i32) {
    %c0_i32 = arith.constant 0 : i32
    %c0_i32_0 = arith.constant 0 : i32
    %c0_i32_1 = arith.constant 0 : i32
    return %c0_i32, %c0_i32_0 : i32, i32
  }
  func.func @transform_2(%arg0: i32) -> (i32, i32) {
    %c0_i32 = arith.constant 0 : i32
    %c0_i32_0 = arith.constant 0 : i32
    %c0_i32_1 = arith.constant 0 : i32
    return %c0_i32, %c0_i32_0 : i32, i32
  }
  func.func @transform_3(%arg0: i32) -> (i32, i32, i32) {
    %c0_i32 = arith.constant 0 : i32
    %c0_i32_0 = arith.constant 0 : i32
    %c0_i32_1 = arith.constant 0 : i32
    return %arg0, %c0_i32, %c0_i32_0 : i32, i32, i32
  }
}

</mosaic_0001>

<bundles_post_ra>
// kernel: tpu_custom_call.1
= control target key start
LH: loop header
LB: loop body
LE: loop exit
PB: predicated region body
PF: predicated region fallthrough
CT: control target
= control target key end

     0   :  { %8 = vsyncpa [#allocation4], 0  ;;  %s1298_s0 = inlined_call_operand.hbm [shape: f32[2,8,512], index: 0, kind: input, shape index: {}]   ;;  %s1299_s1 = inlined_call_operand.vmem [shape: f32[32,72], index: 1, kind: input, shape index: {}]   ;;  %s1300_s2 = inlined_call_operand.vmem [shape: f32[32,1], index: 2, kind: input, shape index: {}]   ;;  %s1301_s3 = inlined_call_operand.hbm [shape: f32[2,32,384], index: 3, kind: output, shape index: {}]  }
   0x1   :  { %10 = vsyncpa [#allocation4 + $0x1], 0 }
   0x2   :  { %11 = vsyncpa [#allocation5], 0 }
   0x3   :  { %13 = vsyncpa [#allocation5 + $0x1], 0  ;;  %s1038_s12 = smov 0   ;;  %s1040_s13 = smov 0  }
   0x4   :  { %s1042_s14 = smov 0   ;;  %s1044_s15 = smov 0  }
   0x5 LB: > { %s1059_s16 = sadd.s32 4294967295, %s1002_s15   ;;  %s695_s17 = sadd.s32 4294967294, %s1002_s15   ;;  %s1002_s15 = sphi %s1044_s15, %s1316_s15   ;;  %s998_s14 = sphi %s1042_s14, %s1315_s14   ;;  %s994_s13 = sphi %s1040_s13, %s1314_s13   ;;  %s990_s12 = sphi %s1038_s12, %s1313_s12  }
   0x6   : > { %s1063_s18 = sadd.s32 1, %s1002_s15   ;;  %s26_s19 = sadd.s32 1, %s998_s14 }
   0x7   : > { %s23_s20 = ssub.s32 %s1002_s15, %s1063_s18  ;;  %p33_p0 = scmp.ne.s32.totalorder %s998_s14, %s994_s13 }
   0x8   : > { %p24_p1 = scmp.eq.s32.totalorder %s23_s20, 0  ;;  %p34_p2 = scmp.eq.s32.totalorder %s1002_s15, 0 }
   0x9   : > { %p39_p3 = scmp.ne.s32.totalorder %s994_s13, %s990_s12  ;;  %p40_p4 = scmp.eq.s32.totalorder %s1059_s16, 0 }
   0xa   : > { %s1075_s21 = scalar_select %p24_p1, %s998_s14, %s26_s19  }
   0xb   : > { %p1077_p5 = por %p34_p2, %p33_p0  ;;  %p1081_p6 = por %p40_p4, %p39_p3 }
   0xc   : > { %p105_p7 = scmp.eq.s32.totalorder %s1059_s16, 1  ;;  %p111_p8 = scmp.eq.s32.totalorder %s695_s17, 1 }
   0xd   : > { %p798_p10 = scmp.lt.s32.totalorder %s1002_s15, 2  ;;  %s137_s26 = sand.u32 1, %s998_s14  }
   0xe   : > { %p1088_p11 = por %p105_p7, %p33_p0  ;;  %p1092_p12 = por %p111_p8, %p39_p3 }
   0xf   : > { %s714_s27 = sshll.u32 %s1002_s15, 9  ;;  %s698_s28 = sshll.u32 %s137_s26, 5 }
  0x10   : > { %s1305_s24 = scalar_select %p1088_p11, 1, 0 }
  0x11   : > { %s1306_s25 = scalar_select %p1092_p12, 1, 0 }
  0x12   : > { %s1101_s4 = scalar_lea.hbm %s1298_s0, %s714_s27  ;;  %s141_s5 = scalar_lea.vmem [#allocation3], %s698_s28 }
  0x13   : > { %s149_s6 = sshll.u32 %s141_s5, 4  ;;  %p1105_p13 = pnand %p798_p10, %p1077_p5  ;;  %s1109_s6 = int_to_ptr.vmem [resolvable:$true] %s149_s6 }
  0x14   : > { %s138_s8 = scalar_lea.sflag [#allocation4], %s137_s26  ;;  %s906_s9 = scalar_lea.hbm %s1101_s4, 512 }
  0x15   : > { %p907_p2 = scmp.ne.s32.totalorder %s1101_s4, %s906_s9  ;;  %p908_p3 = pneg %p1105_p13 }
  0x16   : > { %s911_s17 = scalar_lea.hbm %s1298_s0, 1024  ;;  %p912_p5 = scmp.lt.u32.totalorder %s1101_s4, %s1298_s0 }
  0x17   : > { %p909_p4 = pnand %p908_p3, %p907_p2  ;;  %p913_p8 = scmp.lt.u32.totalorder %s911_s17, %s906_s9 }
  0x18   : > { %p915_p9 = scmp.lt.u32.totalorder %s906_s9, %s1101_s4 }
  0x19   : > { %p910_p7 = pneg %p909_p4  ;;  %p914_p10 = por %p913_p8, %p912_p5 }
  0x1b   : > { %p916_p0 = por %p915_p9, %p914_p10 }
  0x1d   : > { %p917_p1 = pnand %p916_p0, %p910_p7 }
  0x1f   : > { %920 = shalt.err (!%p917_p1)
}
  0x20   : > { %s921_s22 = scalar_lea.vmem %s1109_s6, 512  ;;  %s1004_s26 = smov [#allocation3]  }
  0x21   : > { %p922_p2 = scmp.ne.s32.totalorder %s1109_s6, %s921_s22  ;;  %s926_s27 = sshll.u32 %s1004_s26, 4  ;;  %s927_s27 = int_to_ptr.vmem [resolvable:$false] %s926_s27 }
  0x22   : > { %s928_s28 = scalar_lea.vmem %s927_s27, 1024  ;;  %p929_p11 = scmp.lt.s32.totalorder %s1109_s6, %s927_s27 }
  0x23   : > { %p924_p4 = pnand %p922_p2, %p908_p3  ;;  %p930_p5 = scmp.lt.s32.totalorder %s928_s28, %s921_s22 }
  0x25   : > { %p925_p12 = pneg %p924_p4  ;;  %p931_p8 = por %p930_p5, %p929_p11 }
  0x27   : > { %p932_p9 = pnand %p931_p8, %p925_p12 }
  0x29   : > { %935 = shalt.err (!%p932_p9)
}
  0x2a   : > { %793 = dma.hbm_to_vmem [thread:$0]  (!%p1105_p13), %s1101_s4, 512, %s1109_s6, %s138_s8  }
  0x2b   : > { %p1308_p0 = scmp.lt.s32.totalorder %s1002_s15, 3  ;;  %p1309_p1 = scmp.ge.s32.totalorder %s1002_s15, 1 }
  0x2d   : > { %p155_p3 = pnand %p1309_p1, %p1308_p0 }
  0x2e   : > { %s1143_s29 = sand.u32 (!%p155_p3), 1, %s994_s13  }
  0x2f   : > { %158 = sbr.rel (%p155_p3) target bundleno = 454 (0x1c6), region = 32  ;;  %s702_s30 = sshll.u32 (!%p155_p3), %s1143_s29, 5 }
  0x30   : > { %s161_s5 = scalar_lea.sflag (!%p155_p3), [#allocation4], %s1143_s29  ;;  %s164_s9 = scalar_lea.vmem (!%p155_p3), [#allocation3], %s702_s30 }
  0x36   : > { %981 = dma.done.wait (%p1081_p6), %s161_s5, 512  }
  0x37   : > { %983 = vsyncadd (%p1081_p6), %s161_s5, 4294966784  ;;  %v1151_v0 = vld [vmem:[%s164_s9 + $0x8] sm:$0xff]  ;;  %v1153_v1 = vld [vmem:[%s164_s9 + $0x10] sm:$0xff]  ;;  %s1005_s4 = smov 126   ;;  %s1006_s6 = smov 127   ;;  %vm397_vm0 = vcmask 588800  }
  0x38   : > { %v1155_v2 = vld [vmem:[%s164_s9] sm:$0xff]  ;;  %v854_v3 = vpack.i.bf16 %v1153_v1, %v1151_v0  ;;  %v190_v4 = vld [vmem:[%s164_s9 + $0x18] sm:$0xff]  ;;  %s1007_s7 = smov 110   ;;  %s1008_s23 = smov 108   ;;  %v1012_v7 = vmov 0.0   ;;  %v1014_v8 = vmov 0  }
  0x39   : > { %v849_v5 = vpack.i.bf16 %v190_v4, %v1155_v2  ;;  %s1009_s8 = smov 109   ;;  %s1010_s10 = smov 91   ;;  %v1163_v6 = vld [vmem:[%s1299_s1] sm:$0xff]  ;;  %474 = vmatprep.mubr.f32.mxu0 %v1012_v7  ;;  %904 = vset.pattern.permute.xlu0 %v1014_v8  ;;  %v374_v10 = vld [vmem:[%s1300_s2 + $0x8] sm:$0xff]  ;;  %v375_v11 = vld [vmem:[%s1300_s2 + $0x10] sm:$0xff]  ;;  %vm206_vm1 = vcmask 1039360  }
  0x3a   : > { %855 = vrot.lane.b32.xlu1 %v854_v3, %s1005_s4  ;;  %845 = vrot.lane.b32.xlu0 %v854_v3, %s1006_s6  ;;  %s1011_s11 = smov 92   ;;  %s1013_s20 = smov 90   ;;  %v373_v9 = vld [vmem:[%s1300_s2] sm:$0xff]  ;;  %v376_v12 = vld [vmem:[%s1300_s2 + $0x18] sm:$0xff]  ;;  %vm224_vm2 = vcmask 1031168   ;;  %vm242_vm3 = vcmask 900096  }
  0x3b   : > { %746 = vmatprep.mubr.msk.f32.mxu1 %vm397_vm0, %v1163_v6  ;;  %905 = vset.pattern.permute.xlu1 %v1014_v8  ;;  %vm260_vm4 = vcmask 891904   ;;  %vm278_vm5 = vcmask 883712   ;;  %vm314_vm6 = vcmask 744448   ;;  %vm296_vm7 = vcmask 752640   ;;  %s784_s17 = smul.u32 96, %s1143_s29  ;;  %s609_s28 = scalar_lea.sflag [#allocation5], %s1143_s29 }
  0x3c   : > { %vm332_vm8 = vcmask 736256   ;;  %p1310_p11 = scmp.ne.s32.totalorder %s1305_s24, 0  ;;  %s1015_s5 = smov [#allocation6]  }
  0x3d   : > { %s1233_s19 = scalar_lea.vmem [#allocation6], %s784_s17  ;;  %s940_s9 = sshll.u32 %s1015_s5, 4  ;;  %s941_s9 = int_to_ptr.vmem [resolvable:$false] %s940_s9 }
  0x3e   : > { %860 = vrot.lane.b32.xlu1 %v854_v3, %s1007_s7  ;;  %850 = vrot.lane.b32.xlu0 %v849_v5, %s1006_s6  ;;  %s622_s22 = sshll.u32 %s1233_s19, 4  ;;  %s1252_s22 = int_to_ptr.vmem [resolvable:$true] %s622_s22 }
  0x3f   : > { %s936_s30 = scalar_lea.vmem %s1252_s22, 1536  ;;  %p943_p7 = scmp.lt.s32.totalorder %s1252_s22, %s941_s9 }
  0x40   : > { %p937_p6 = scmp.ne.s32.totalorder %s1252_s22, %s936_s30 }
  0x42   : > { %870 = vrot.lane.b32.xlu1 %v849_v5, %s1007_s7  ;;  %865 = vrot.lane.b32.xlu0 %v849_v5, %s1005_s4  ;;  %p938_p12 = pnand %p937_p6, %p1310_p11  ;;  %s942_s4 = scalar_lea.vmem %s941_s9, 3072 }
  0x43   : > { %p944_p10 = scmp.lt.s32.totalorder %s942_s4, %s936_s30 }
  0x44   : > { %p939_p13 = pneg %p938_p12 }
  0x45   : > { %p945_p2 = por %p944_p10, %p943_p7 }
  0x46   : > { %880 = vrot.lane.b32.xlu1 %v854_v3, %s1008_s23  ;;  %875 = vrot.lane.b32.xlu0 %v854_v3, %s1009_s8 }
  0x47   : > { %p946_p4 = pnand %p945_p2, %p939_p13 }
  0x4a   : > { %890 = vrot.lane.b32.xlu1 %v849_v5, %s1008_s23  ;;  %885 = vrot.lane.b32.xlu0 %v849_v5, %s1009_s8 }
  0x4e   : > { %900 = vrot.lane.b32.xlu1 %v854_v3, %s1010_s10  ;;  %895 = vrot.lane.b32.xlu0 %v854_v3, %s1011_s11 }
  0x52   : > { %306 = vrot.lane.b32.xlu1 %v1155_v2, %s1010_s10  ;;  %288 = vrot.lane.b32.xlu0 %v1155_v2, %s1011_s11 }
  0x56   : > { %328 = vrot.lane.b32.xlu1 %v1153_v1, %s1013_s20  ;;  %326 = vrot.lane.b32.xlu0 %v1151_v0, %s1013_s20 }
  0x5a   : > { %294 = vrot.lane.b32.xlu1 %v190_v4, %s1011_s11  ;;  %324 = vrot.lane.b32.xlu0 %v1155_v2, %s1013_s20 }
  0x5e   : > { %330 = vrot.lane.b32.xlu1 %v190_v4, %s1013_s20  ;;  %312 = vrot.lane.b32.xlu0 %v190_v4, %s1010_s10  ;;  %s785_s20 = smul.u32 1536, %s1059_s16 }
  0x60   : > { %s1250_s16 = scalar_lea.hbm %s1301_s3, %s785_s20 }
  0x62   : > { %379 = vperm.xlu0 %904, %v373_v9   ;;  %384 = vperm.xlu1 %905, %v374_v10  }
  0x66   : > { %389 = vperm.xlu1 %905, %v375_v11   ;;  %394 = vperm.xlu0 %904, %v376_v12  }
  0xac   : > { %v856_v13 = vpop.permute.xlu1 %855  ;;  %v846_v14 = vpop.permute.xlu0 %845 }
  0xad   : > { %v858_v15 = vunpack.i.h.bf16 %v856_v13  ;;  %v857_v16 = vunpack.i.l.bf16 %v856_v13  ;;  %v848_v17 = vunpack.i.h.bf16 %v846_v14  ;;  %v847_v18 = vunpack.i.l.bf16 %v846_v14 }
  0xaf   : > { %v208_v19 = vsel %vm206_vm1, %v847_v18, %v848_v17  ;;  %v226_v23 = vsel %vm224_vm2, %v857_v16, %v858_v15 }
  0xb0   : > { %v861_v20 = vpop.permute.xlu1 %860  ;;  %v851_v21 = vpop.permute.xlu0 %850  ;;  %v752_v22 = vpack.c.bf16 %v208_v19, %v1151_v0 }
  0xb1   : > { %v863_v24 = vunpack.i.h.bf16 %v861_v20  ;;  %v862_v25 = vunpack.i.l.bf16 %v861_v20  ;;  %v853_v26 = vunpack.i.h.bf16 %v851_v21  ;;  %v852_v27 = vunpack.i.l.bf16 %v851_v21 }
  0xb2   : > { %753 = vmatprep.subr.bf16.mxu0 %v752_v22 }
  0xb3   : > { %v207_v28 = vsel %vm206_vm1, %v852_v27, %v847_v18  ;;  %v209_v29 = vsel %vm206_vm1, %v848_v17, %v853_v26  ;;  %v244_v30 = vsel %vm242_vm3, %v862_v25, %v863_v24  ;;  %v343_v26 = vld [vmem:[%s1299_s1 + $0x8] sm:$0xff] }
  0xb4   : > { %v871_v31 = vpop.permute.xlu1 %870  ;;  %v866_v32 = vpop.permute.xlu0 %865  ;;  %v754_v33 = vpack.c.bf16 %v207_v28, %v1155_v2  ;;  %v768_v34 = vpack.c.bf16 %v209_v29, %v1153_v1  ;;  %v756_v35 = vpack.c.bf16 %v244_v30, %v226_v23 }
  0xb5   : > { %v873_v36 = vunpack.i.h.bf16 %v871_v31  ;;  %v872_v37 = vunpack.i.l.bf16 %v871_v31  ;;  %v868_v38 = vunpack.i.h.bf16 %v866_v32  ;;  %v867_v39 = vunpack.i.l.bf16 %v866_v32  ;;  %v345_v32 = vld [vmem:[%s1299_s1 + $0x18] sm:$0xff] }
  0xb6   : > { %755 = vmatpush1.bf16.msra.mxu0 %v754_v33  ;;  %769 = vmatprep.subr.bf16.mxu1 %v768_v34 }
  0xb7   : > { %757 = vmatprep.subr.bf16.mxu0 %v756_v35  ;;  %771 = vmatpush3.bf16.msra.mxu1 %v768_v34  ;;  %v225_v40 = vsel %vm224_vm2, %v867_v39, %v857_v16  ;;  %v243_v41 = vsel %vm242_vm3, %v872_v37, %v862_v25  ;;  %v227_v42 = vsel %vm224_vm2, %v858_v15, %v868_v38 }
  0xb8   : > { %v881_v43 = vpop.permute.xlu1 %880  ;;  %v876_v44 = vpop.permute.xlu0 %875  ;;  %v758_v45 = vpack.c.bf16 %v243_v41, %v225_v40  ;;  %v245_v46 = vsel %vm242_vm3, %v863_v24, %v873_v36 }
  0xb9   : > { %v883_v47 = vunpack.i.h.bf16 %v881_v43  ;;  %v882_v48 = vunpack.i.l.bf16 %v881_v43  ;;  %v878_v49 = vunpack.i.h.bf16 %v876_v44  ;;  %v877_v50 = vunpack.i.l.bf16 %v876_v44 }
  0xba   : > { %759 = vmatpush1.bf16.msra.mxu0 %v758_v45  ;;  %v772_v51 = vpack.c.bf16 %v245_v46, %v227_v42 }
  0xbb   : > { %v262_v52 = vsel %vm260_vm4, %v877_v50, %v878_v49  ;;  %v280_v53 = vsel %vm278_vm5, %v882_v48, %v883_v47 }
  0xbc   : > { %773 = vmatprep.subr.bf16.mxu1 %v772_v51  ;;  %v891_v54 = vpop.permute.xlu1 %890  ;;  %v886_v55 = vpop.permute.xlu0 %885  ;;  %v760_v56 = vpack.c.bf16 %v280_v53, %v262_v52 }
  0xbd   : > { %775 = vmatpush3.bf16.msra.mxu1 %v772_v51  ;;  %v893_v57 = vunpack.i.h.bf16 %v891_v54  ;;  %v892_v58 = vunpack.i.l.bf16 %v891_v54  ;;  %v888_v59 = vunpack.i.h.bf16 %v886_v55  ;;  %v887_v60 = vunpack.i.l.bf16 %v886_v55 }
  0xbe   : > { %761 = vmatprep.subr.bf16.mxu0 %v760_v56 }
  0xbf   : > { %v261_v61 = vsel %vm260_vm4, %v887_v60, %v877_v50  ;;  %v279_v62 = vsel %vm278_vm5, %v892_v58, %v882_v48  ;;  %v263_v63 = vsel %vm260_vm4, %v878_v49, %v888_v59  ;;  %v281_v0 = vsel %vm278_vm5, %v883_v47, %v893_v57 }
  0xc0   : > { %v901_v1 = vpop.permute.xlu1 %900  ;;  %v896_v2 = vpop.permute.xlu0 %895  ;;  %v762_v3 = vpack.c.bf16 %v279_v62, %v261_v61  ;;  %v776_v4 = vpack.c.bf16 %v281_v0, %v263_v63 }
  0xc1   : > { %v903_v5 = vunpack.i.h.bf16 %v901_v1  ;;  %v902_v8 = vunpack.i.l.bf16 %v901_v1  ;;  %v898_v9 = vunpack.i.h.bf16 %v896_v2  ;;  %v897_v10 = vunpack.i.l.bf16 %v896_v2 }
  0xc2   : > { %763 = vmatpush1.bf16.msra.mxu0 %v762_v3  ;;  %777 = vmatprep.subr.bf16.mxu1 %v776_v4 }
  0xc3   : > { %779 = vmatpush3.bf16.msra.mxu1 %v776_v4  ;;  %v298_v11 = vsel %vm296_vm7, %v897_v10, %v898_v9  ;;  %v316_v12 = vsel %vm314_vm6, %v902_v8, %v903_v5 }
  0xc4   : > { %v307_v13 = vpop.permute.xlu1 %306  ;;  %v289_v14 = vpop.permute.xlu0 %288  ;;  %v764_v15 = vpack.c.bf16 %v316_v12, %v298_v11 }
  0xc5   : > { %v315_v16 = vsel %vm314_vm6, %v307_v13, %v902_v8  ;;  %v297_v17 = vsel %vm296_vm7, %v289_v14, %v897_v10 }
  0xc6   : > { %v766_v18 = vpack.c.bf16 %v315_v16, %v297_v17  ;;  %765 = vmatprep.subr.bf16.mxu0 %v764_v15 }
  0xc8   : > { %v329_v19 = vpop.permute.xlu1 %328  ;;  %v327_v20 = vpop.permute.xlu0 %326  ;;  %767 = vmatpush1.bf16.msra.mxu0 %v766_v18 }
  0xc9   : > { %v334_v21 = vsel %vm332_vm8, %v327_v20, %v329_v19 }
  0xca   : > { %426 = vmatprep.subr.mxu0 %v334_v21 }
  0xcc   : > { %v295_v22 = vpop.permute.xlu1 %294  ;;  %v325_v23 = vpop.permute.xlu0 %324 }
  0xcd   : > { %v333_v24 = vsel %vm332_vm8, %v325_v23, %v327_v20  ;;  %v299_v27 = vsel %vm296_vm7, %v898_v9, %v295_v22 }
  0xce   : > { %427 = vmatpush1.msra.mxu0 %v333_v24 }
  0xcf   : > { %703 = vmatmul.mubr.msk.f32.vlgmr.msra.gmra.mrb[0].mxu0 %vm397_vm0, %v1163_v6  ;;  %v344_v6 = vld [vmem:[%s1299_s1 + $0x10] sm:$0xff] }
  0xd0   : > { %v313_v25 = vpop.permute.xlu0 %312  ;;  %480 = vmatprep.mubr.f32.mxu0 %v1012_v7  ;;  %v331_v29 = vpop.permute.xlu1 %330 }
  0xd1   : > { %v317_v28 = vsel %vm314_vm6, %v903_v5, %v313_v25  ;;  %v335_v31 = vsel %vm332_vm8, %v329_v19, %v331_v29 }
  0xd2   : > { %v780_v30 = vpack.c.bf16 %v317_v28, %v299_v27 }
  0xd3   : > { %704 = vmatmul.mubr.msk.f32.gmra.mrb[2].mxu0 %vm397_vm0, %v343_v26 }
  0xd4   : > { %781 = vmatprep.subr.bf16.mxu1 %v780_v30  ;;  %486 = vmatprep.mubr.f32.mxu0 %v1012_v7 }
  0xd5   : > { %783 = vmatpush3.bf16.msra.mxu1 %v780_v30 }
  0xd6   : > { %744 = vmatprep.subr.mxu1 %v335_v31 }
  0xd7   : > { %705 = vmatmul.mubr.msk.f32.gmra.mrb[4].mxu0 %vm397_vm0, %v344_v6 }
  0xd8   : > { %492 = vmatprep.mubr.f32.mxu0 %v1012_v7 }
  0xd9   : > { %745 = vmatpush3.msra.mxu1 %v335_v31 }
  0xda   : > { %747 = vmatmul.mubr.msk.f32.vlgmr.msra.gmra.mrb[0].mxu1 %vm397_vm0, %v343_v26 }
  0xdb   : > { %706 = vmatmul.mubr.msk.f32.gmra.mrb[6].mxu0 %vm397_vm0, %v345_v32  ;;  %749 = vmatprep.mubr.msk.f32.mxu1 %vm397_vm0, %v344_v6 }
  0xde   : > { %750 = vmatmul.mubr.msk.f32.gmra.mrb[2].mxu1 %vm397_vm0, %v345_v32 }
  0xe1   : > { %v380_v33 = vpop.permute.xlu0 %379  ;;  %v385_v35 = vpop.permute.xlu1 %384 }
  0xe5   : > { %v390_v44 = vpop.permute.xlu1 %389  ;;  %v395_v51 = vpop.permute.xlu0 %394 }
 0x1a2   : > { %v476_v34 = vpop.f32.mrb[0].mxu0 }
 0x1a3   : > { %v477_v36 = vadd.f32 %v476_v34, %v380_v33  ;;  %v478_v37 = vpop.f32.mrb[1].mxu0 }
 0x1a4   : > { %v479_v7 = vadd.f32 %v478_v37, %v380_v33 }
 0x1a5   : > { %v584_v38 = vmax.f32 %v477_v36, 0.0 }
 0x1a6   : > { %v585_v39 = vmax.f32 %v479_v7, 0.0  ;;  %v482_v40 = vpop.f32.mrb[2].mxu0 }
 0x1a7   : > { %596 = vst [vmem:[%s1233_s19] sm:$0xff] %v584_v38  ;;  %v483_v41 = vadd.f32 %v482_v40, %v385_v35  ;;  %v484_v42 = vpop.f32.mrb[3].mxu0 }
 0x1a8   : > { %597 = vst [vmem:[%s1233_s19 + $0x8] sm:$0xff] %v585_v39  ;;  %v485_v43 = vadd.f32 %v484_v42, %v385_v35 }
 0x1a9   : > { %v587_v45 = vmax.f32 %v483_v41, 0.0 }
 0x1aa   : > { %v588_v46 = vmax.f32 %v485_v43, 0.0  ;;  %v488_v47 = vpop.f32.mrb[4].mxu0 }
 0x1ab   : > { %599 = vst [vmem:[%s1233_s19 + $0x18] sm:$0xff] %v587_v45  ;;  %v489_v48 = vadd.f32 %v488_v47, %v390_v44  ;;  %v490_v49 = vpop.f32.mrb[5].mxu0 }
 0x1ac   : > { %600 = vst [vmem:[%s1233_s19 + $0x20] sm:$0xff] %v588_v46  ;;  %v491_v50 = vadd.f32 %v490_v49, %v390_v44 }
 0x1ad   : > { %v590_v52 = vmax.f32 %v489_v48, 0.0  ;;  %v748_v53 = vpop.f32.mrb[0].mxu1 }
 0x1ae   : > { %v591_v54 = vmax.f32 %v491_v50, 0.0  ;;  %v571_v55 = vadd.f32 %v748_v53, %v385_v35  ;;  %v494_v56 = vpop.f32.mrb[6].mxu0  ;;  %v565_v57 = vpop.f32.mrb[1].mxu1 }
 0x1af   : > { %602 = vst [vmem:[%s1233_s19 + $0x30] sm:$0xff] %v590_v52  ;;  %v495_v58 = vadd.f32 %v494_v56, %v395_v51  ;;  %v566_v59 = vadd.f32 %v565_v57, %v380_v33  ;;  %v496_v60 = vpop.f32.mrb[7].mxu0 }
 0x1b0   : > { %603 = vst [vmem:[%s1233_s19 + $0x38] sm:$0xff] %v591_v54  ;;  %v589_v61 = vmax.f32 %v571_v55, 0.0  ;;  %v497_v62 = vadd.f32 %v496_v60, %v395_v51 }
 0x1b1   : > { %v593_v63 = vmax.f32 %v495_v58, 0.0  ;;  %v586_v0 = vmax.f32 %v566_v59, 0.0  ;;  %v751_v1 = vpop.f32.mrb[2].mxu1 }
 0x1b2   : > { %601 = vst [vmem:[%s1233_s19 + $0x28] sm:$0xff] %v589_v61  ;;  %v594_v2 = vmax.f32 %v497_v62, 0.0  ;;  %v581_v3 = vadd.f32 %v751_v1, %v395_v51  ;;  %v575_v4 = vpop.f32.mrb[3].mxu1 }
 0x1b3   : > { %605 = vst [vmem:[%s1233_s19 + $0x48] sm:$0xff] %v593_v63  ;;  %598 = vst [vmem:[%s1233_s19 + $0x10] sm:$0xff] %v586_v0  ;;  %v576_v5 = vadd.f32 %v575_v4, %v390_v44 }
 0x1b4   : > { %606 = vst [vmem:[%s1233_s19 + $0x50] sm:$0xff] %v594_v2  ;;  %v595_v8 = vmax.f32 %v581_v3, 0.0 }
 0x1b5   : > { %v592_v9 = vmax.f32 %v576_v5, 0.0 }
 0x1b6   : > { %607 = vst [vmem:[%s1233_s19 + $0x58] sm:$0xff] %v595_v8 }
 0x1b7   : > { %604 = vst [vmem:[%s1233_s19 + $0x40] sm:$0xff] %v592_v9 }
 0x1b8   : > { %949 = shalt.err (!%p946_p4)
}
 0x1b9   : > { %s950_s6 = scalar_lea.hbm %s1250_s16, 1536  ;;  %s954_s8 = scalar_lea.hbm %s1301_s3, 3072 }
 0x1ba   : > { %p951_p5 = scmp.ne.s32.totalorder %s1250_s16, %s950_s6  ;;  %p955_p0 = scmp.lt.u32.totalorder %s1250_s16, %s1301_s3 }
 0x1bb   : > { %p956_p1 = scmp.lt.u32.totalorder %s954_s8, %s950_s6  ;;  %p958_p6 = scmp.lt.u32.totalorder %s950_s6, %s1250_s16 }
 0x1bc   : > { %p952_p8 = pnand %p951_p5, %p1310_p11 }
 0x1bd   : > { %p957_p3 = por %p956_p1, %p955_p0 }
 0x1be   : > { %p953_p9 = pneg %p952_p8 }
 0x1bf   : > { %p959_p12 = por %p958_p6, %p957_p3 }
 0x1c1   : > { %p960_p13 = pnand %p959_p12, %p953_p9 }
 0x1c3   : > { %963 = shalt.err (!%p960_p13)
}
 0x1c4   : > { %s1016_s17 = smov 384   ;;  %s1017_s19 = smov 24  }
 0x1c5   : > { %788 = dma.vmem_to_hbm [thread:$0]  (%p1310_p11), %s1252_s22, 1536, %s1250_s16, %s609_s28, %s1016_s17, %s1016_s17, %s1017_s19  }
 0x1c6 PF: > { %s637_s20 = sand.u32 1, %s990_s12   ;;  %p1311_p7 = scmp.ne.s32.totalorder %s1306_s25, 0 }
 0x1c7   : > { %p1312_p10 = scmp.ge.s32.totalorder %s1002_s15, 2  ;;  %s638_s26 = scalar_lea.sflag [#allocation5], %s637_s20 }
 0x1c9   : > { %p795_p2 = pnand %p1312_p10, %p1311_p7 }
 0x1cb   : > { %985 = dma.done.wait (!%p795_p2), %s638_s26, 1536  }
 0x1cc   : > { %987 = vsyncadd (!%p795_p2), %s638_s26, 4294965760  ;;  %p16_p4 = scmp.ge.s32.totalorder %s1063_s18, 4   ;;  %s1313_s12 = smov %s994_s13 }
 0x1cd   : > { %s1314_s13 = smov %s998_s14  ;;  %s1315_s14 = smov %s1075_s21 }
 0x1ce   : > { %s1316_s15 = smov %s1063_s18  ;;  %18 = sbr.rel (!%p16_p4) target bundleno = 5 (0x5), region = 77 }
 0x1d5   :  { %643 = vsyncpa [#allocation4], 1 }
 0x1d6   :  { %645 = vsyncpa [#allocation4 + $0x1], 1 }
 0x1d7   :  { %646 = vsyncpa [#allocation5], 1 }
 0x1d8   :  { %648 = vsyncpa [#allocation5 + $0x1], 1 }

</bundles_post_ra>
